<compile_context>
chip_gen: v5e
topology: v5e:2x2
jax: 0.10.0
libtpu: 0.0.40
codegen_flags: <defaults>
</compile_context>

<pallas_src>
import jax
import jax.numpy as jnp
from jax.experimental import pallas as pl
from jax.experimental.pallas import tpu as pltpu

NUM_CLASSES = 2
LANE = 128                      # lane width / padded class dimension
DEFAULT_TILE_B = 512            # batch tile (multiple of 8), sized for pipelining


def clone_head_kernel(x_ref, w1_ref, b1_ref, w2_ref, b2_ref, prob_ref):
    # x:(TB, 2H) bf16 | w1:(2H, H) bf16 | b1:(1, H) f32
    # w2:(H, LANE) bf16 (zero-padded cols) | b2:(1, LANE) f32 (-1e30 padded cols)
    # prob:(TB, LANE) f32
    # dense: Linear(2H -> H), f32 accumulate, f32 bias/tanh
    h = jnp.dot(x_ref[...], w1_ref[...], preferred_element_type=jnp.float32)
    h = jnp.tanh(h + b1_ref[...])

    # out_proj: Linear(H -> 2), lane-padded to 128 columns
    logits = jnp.dot(h.astype(w2_ref.dtype), w2_ref[...],
                     preferred_element_type=jnp.float32) + b2_ref[...]

    # softmax over the (padded) class dim; padded columns carry -1e30 bias -> exp == 0
    m = jnp.max(logits, axis=-1, keepdims=True)
    e = jnp.exp(logits - m)
    denom = jnp.sum(e, axis=-1, keepdims=True)
    prob_ref[...] = (e * pl.reciprocal(denom, approx=True)).astype(prob_ref.dtype)


def prepare_clone_head_params(w_dense, b_dense, w_out, b_out,
                              compute_dtype=jnp.bfloat16):
    """One-time parameter prep: transpose, lane-pad, cast. Do NOT redo per call."""
    hidden = w_out.shape[1]
    w1 = jnp.transpose(w_dense).astype(compute_dtype)                 # (2H, H)
    b1 = b_dense.reshape(1, -1).astype(jnp.float32)                   # (1, H)
    w2 = jnp.zeros((hidden, LANE), compute_dtype)
    w2 = w2.at[:, :NUM_CLASSES].set(jnp.transpose(w_out).astype(compute_dtype))
    b2 = jnp.full((1, LANE), -1e30, jnp.float32)
    b2 = b2.at[:, :NUM_CLASSES].set(b_out.astype(jnp.float32))        # (1, LANE)
    return w1, b1, w2, b2


def clone_model_forward(vec, params, tile_b=DEFAULT_TILE_B):
    """vec: (2*B, H) pooled encoder outputs.  params from prepare_clone_head_params.
    Returns prob: (B, 2)."""
    two_b, hidden = vec.shape
    assert two_b % 2 == 0, "clone detection expects paired sequences"
    w1, b1, w2, b2 = params
    two_h = 2 * hidden

    x = vec.reshape(-1, two_h).astype(w1.dtype)      # (B, 2H) — glue reshape in JAX
    batch = x.shape[0]

    # Batch tile: full extent if batch is small, else a multiple of 8 (8,128 rule).
    tb = batch if batch <= tile_b else max(8, (tile_b // 8) * 8)
    grid = (pl.cdiv(batch, tb),)

    # VMEM budget: double-buffered x and out tiles + resident weights + headroom.
    budget = (2 * tb * two_h * x.dtype.itemsize          # x tiles (double-buffered)
              + 2 * tb * LANE * 4                        # out tiles (double-buffered)
              + two_h * hidden * w1.dtype.itemsize       # resident W1
              + hidden * LANE * w2.dtype.itemsize        # resident W2
              + (hidden + LANE) * 4)                     # biases
    vmem_limit = int(min(max(budget + (8 << 20), 32 << 20), 60 << 20))

    prob_padded = pl.pallas_call(
        clone_head_kernel,
        out_shape=jax.ShapeDtypeStruct((batch, LANE), jnp.float32),
        grid=grid,
        in_specs=[
            pl.BlockSpec((tb, two_h), lambda i: (i, 0)),        # x: tiled on batch
            pl.BlockSpec((two_h, hidden), lambda i: (0, 0)),    # W1: resident
            pl.BlockSpec((1, hidden), lambda i: (0, 0)),        # b1: resident
            pl.BlockSpec((hidden, LANE), lambda i: (0, 0)),     # W2: resident
            pl.BlockSpec((1, LANE), lambda i: (0, 0)),          # b2: resident
        ],
        out_specs=pl.BlockSpec((tb, LANE), lambda i: (i, 0)),
        compiler_params=pltpu.CompilerParams(
            dimension_semantics=("parallel",),
            vmem_limit_bytes=vmem_limit,
        ),
    )(x, w1, b1, w2, b2)

    return prob_padded[:, :NUM_CLASSES]


def _torch_linear_init(key, fan_out, fan_in):
    """Deterministic stand-in for nn.Linear default init: U(-1/sqrt(fan_in), +)."""
    kw, kb = jax.random.split(key)
    bound = 1.0 / (fan_in ** 0.5)
    w = jax.random.uniform(kw, (fan_out, fan_in), jnp.float32, -bound, bound)
    b = jax.random.uniform(kb, (fan_out,), jnp.float32, -bound, bound)
    return w, b


if __name__ == "__main__":
    key = jax.random.PRNGKey(0)
    k_vec, k_dense, k_out = jax.random.split(key, 3)

    hidden_size = 32          # config.hidden_size (small synthetic)
    num_pairs = 2             # B: number of clone pairs
    num_seqs = 2 * num_pairs  # each pair = 2 sequences

    # Synthetic pooled encoder output "vec": (2*B, H)
    vec = jax.random.normal(k_vec, (num_seqs, hidden_size), jnp.float32)

    # RobertaClassificationHead parameters
    w_dense, b_dense = _torch_linear_init(k_dense, hidden_size, hidden_size * 2)
    w_out, b_out = _torch_linear_init(k_out, 2, hidden_size)

    params = prepare_clone_head_params(w_dense, b_dense, w_out, b_out)
    prob = clone_model_forward(vec, params)
    prob = jax.block_until_ready(prob)

    # Reference check in plain f32 JAX (bf16 matmul inputs -> looser tolerance)
    x_ref = vec.reshape(-1, 2 * hidden_size)
    h_ref = jnp.tanh(x_ref @ w_dense.T + b_dense)
    logits_ref = h_ref @ w_out.T + b_out
    prob_ref = jax.nn.softmax(logits_ref, axis=-1)

    assert prob.shape == (num_pairs, 2)
    assert jnp.allclose(prob, prob_ref, atol=2e-2), "mismatch vs reference"
    assert jnp.allclose(jnp.sum(prob, axis=-1), 1.0, atol=1e-2)

    print("KERNEL_OK")
</pallas_src>

<mosaic_0001>
module attributes {stable_mosaic.version = 11 : i64} {
  func.func @clone_head_kernel(%arg0: i32, %arg1: memref<2x64xbf16, #tpu.memory_space<vmem>>, %arg2: memref<64x32xbf16, #tpu.memory_space<vmem>>, %arg3: memref<1x32xf32, #tpu.memory_space<vmem>>, %arg4: memref<32x128xbf16, #tpu.memory_space<vmem>>, %arg5: memref<1x128xf32, #tpu.memory_space<vmem>>, %arg6: memref<2x128xf32, #tpu.memory_space<vmem>>) attributes {dimension_semantics = [#tpu.dimension_semantics<parallel>], iteration_bounds = array<i64: 1>, scalar_prefetch = 0 : i64, scratch_operands = 0 : i64, tpu.core_type = #tpu.core_type<tc>, window_params = [{transform_indices = @transform_0, window_bounds = array<i64: 2, 64>}, {pipeline_mode = #tpu.pipeline_mode<synchronous>, transform_indices = @transform_1, window_bounds = array<i64: 64, 32>}, {pipeline_mode = #tpu.pipeline_mode<synchronous>, transform_indices = @transform_2, window_bounds = array<i64: 1, 32>}, {pipeline_mode = #tpu.pipeline_mode<synchronous>, transform_indices = @transform_3, window_bounds = array<i64: 32, 128>}, {pipeline_mode = #tpu.pipeline_mode<synchronous>, transform_indices = @transform_4, window_bounds = array<i64: 1, 128>}, {transform_indices = @transform_5, window_bounds = array<i64: 2, 128>}]} {
    %c0 = arith.constant 0 : index
    %c0_0 = arith.constant 0 : index
    %0 = vector.load %arg1[%c0, %c0_0] : memref<2x64xbf16, #tpu.memory_space<vmem>>, vector<2x64xbf16>
    %c0_1 = arith.constant 0 : index
    %c0_2 = arith.constant 0 : index
    %1 = vector.load %arg2[%c0_1, %c0_2] : memref<64x32xbf16, #tpu.memory_space<vmem>>, vector<64x32xbf16>
    %cst = arith.constant dense<0.000000e+00> : vector<2x32xf32>
    %2 = tpu.matmul %0, %1, %cst {dimension_numbers = #tpu.dot_dimension_numbers<[1], [0], [0], [1], [0, 0, 1, 1], [], []>} : vector<2x64xbf16>, vector<64x32xbf16>, vector<2x32xf32> -> vector<2x32xf32>
    %c0_3 = arith.constant 0 : index
    %c0_4 = arith.constant 0 : index
    %3 = vector.load %arg3[%c0_3, %c0_4] : memref<1x32xf32, #tpu.memory_space<vmem>>, vector<1x32xf32>
    %4 = vector.broadcast %3 : vector<1x32xf32> to vector<2x32xf32>
    %5 = arith.addf %2, %4 : vector<2x32xf32>
    %6 = math.tanh %5 : vector<2x32xf32>
    %7 = arith.truncf %6 : vector<2x32xf32> to vector<2x32xbf16>
    %c0_5 = arith.constant 0 : index
    %c0_6 = arith.constant 0 : index
    %8 = vector.load %arg4[%c0_5, %c0_6] : memref<32x128xbf16, #tpu.memory_space<vmem>>, vector<32x128xbf16>
    %cst_7 = arith.constant dense<0.000000e+00> : vector<2x128xf32>
    %9 = tpu.matmul %7, %8, %cst_7 {dimension_numbers = #tpu.dot_dimension_numbers<[1], [0], [0], [1], [0, 0, 1, 1], [], []>} : vector<2x32xbf16>, vector<32x128xbf16>, vector<2x128xf32> -> vector<2x128xf32>
    %c0_8 = arith.constant 0 : index
    %c0_9 = arith.constant 0 : index
    %10 = vector.load %arg5[%c0_8, %c0_9] : memref<1x128xf32, #tpu.memory_space<vmem>>, vector<1x128xf32>
    %11 = vector.broadcast %10 : vector<1x128xf32> to vector<2x128xf32>
    %12 = arith.addf %9, %11 : vector<2x128xf32>
    %cst_10 = arith.constant dense<0xFF800000> : vector<2xf32>
    %13 = vector.multi_reduction <maximumf>, %12, %cst_10 [1] : vector<2x128xf32> to vector<2xf32>
    %14 = vector.shape_cast %13 : vector<2xf32> to vector<2x1xf32>
    %15 = vector.broadcast %14 : vector<2x1xf32> to vector<2x128xf32>
    %16 = arith.subf %12, %15 : vector<2x128xf32>
    %17 = math.exp %16 : vector<2x128xf32>
    %cst_11 = arith.constant dense<0.000000e+00> : vector<2xf32>
    %18 = vector.multi_reduction <add>, %17, %cst_11 [1] : vector<2x128xf32> to vector<2xf32>
    %19 = vector.shape_cast %18 : vector<2xf32> to vector<2x1xf32>
    %20 = tpu.reciprocal %19 {approx = true} : vector<2x1xf32> -> vector<2x1xf32>
    %21 = vector.broadcast %20 : vector<2x1xf32> to vector<2x128xf32>
    %22 = arith.mulf %17, %21 : vector<2x128xf32>
    %c0_12 = arith.constant 0 : index
    %c0_13 = arith.constant 0 : index
    %23 = vector.load %arg6[%c0_12, %c0_13] : memref<2x128xf32, #tpu.memory_space<vmem>>, vector<2x128xf32>
    tpu.vector_store %arg6[%c0_12, %c0_13], %22 {strides = array<i32>} : memref<2x128xf32, #tpu.memory_space<vmem>>, vector<2x128xf32>,
    return
  }
  func.func @transform_0(%arg0: i32) -> (i32, i32) {
    %c0_i32 = arith.constant 0 : i32
    %c0_i32_0 = arith.constant 0 : i32
    return %arg0, %c0_i32 : i32, i32
  }
  func.func @transform_1(%arg0: i32) -> (i32, i32) {
    %c0_i32 = arith.constant 0 : i32
    %c0_i32_0 = arith.constant 0 : i32
    %c0_i32_1 = arith.constant 0 : i32
    return %c0_i32, %c0_i32_0 : i32, i32
  }
  func.func @transform_2(%arg0: i32) -> (i32, i32) {
    %c0_i32 = arith.constant 0 : i32
    %c0_i32_0 = arith.constant 0 : i32
    %c0_i32_1 = arith.constant 0 : i32
    return %c0_i32, %c0_i32_0 : i32, i32
  }
  func.func @transform_3(%arg0: i32) -> (i32, i32) {
    %c0_i32 = arith.constant 0 : i32
    %c0_i32_0 = arith.constant 0 : i32
    %c0_i32_1 = arith.constant 0 : i32
    return %c0_i32, %c0_i32_0 : i32, i32
  }
  func.func @transform_4(%arg0: i32) -> (i32, i32) {
    %c0_i32 = arith.constant 0 : i32
    %c0_i32_0 = arith.constant 0 : i32
    %c0_i32_1 = arith.constant 0 : i32
    return %c0_i32, %c0_i32_0 : i32, i32
  }
  func.func @transform_5(%arg0: i32) -> (i32, i32) {
    %c0_i32 = arith.constant 0 : i32
    %c0_i32_0 = arith.constant 0 : i32
    return %arg0, %c0_i32 : i32, i32
  }
}

</mosaic_0001>

<bundles_post_ra>
// kernel: tpu_custom_call.1
= control target key start
LH: loop header
LB: loop body
LE: loop exit
PB: predicated region body
PF: predicated region fallthrough
CT: control target
= control target key end

     0   :  { %s272_s0 = inlined_call_operand.vmem [shape: bf16[2,64], index: 0, kind: input, shape index: {}]   ;;  %s273_s1 = inlined_call_operand.vmem [shape: bf16[64,32], index: 1, kind: input, shape index: {}]   ;;  %s274_s2 = inlined_call_operand.vmem [shape: f32[1,32], index: 2, kind: input, shape index: {}]   ;;  %s275_s3 = inlined_call_operand.vmem [shape: bf16[32,128], index: 3, kind: input, shape index: {}]   ;;  %s276_s4 = inlined_call_operand.vmem [shape: f32[1,128], index: 4, kind: input, shape index: {}]   ;;  %s277_s5 = inlined_call_operand.hbm [shape: f32[2,128], index: 5, kind: output, shape index: {}]  }
   0x1   :  { %v173_v0 = vld [vmem:[%s273_s1 + $0x18] sm:$0xff]  ;;  %v172_v1 = vld [vmem:[%s273_s1 + $0x10] sm:$0xff] }
   0x2   :  { %67 = vmatpush.bf16.msra.mxu0 %v173_v0 }
   0x3   :  { %10 = vsyncpa [#allocation3], 0  ;;  %v171_v2 = vld [vmem:[%s273_s1 + $0x8] sm:$0xff]  ;;  %v170_v3 = vld [vmem:[%s273_s1] sm:$0xff]  ;;  %vm59_vm0 = vcmask 523264   ;;  %vm98_vm1 = vcmask 261120  }
   0x4   :  { %v22_v4 = vld [vmem:[%s272_s0] sm:$0x1]  ;;  %v175_v5 = vld [vmem:[%s275_s3 + $0x8] sm:$0xff]  ;;  %vm115_vm2 = vcmask 1041408  }
   0x5   :  { %108 = vmatpush.bf16.msra.mxu1 %v175_v5  ;;  %v174_v6 = vld [vmem:[%s275_s3] sm:$0xff] }
   0x6   :  { %68 = vmatpush.bf16.msra.mxu0 %v172_v1  ;;  %v177_v7 = vld [vmem:[%s274_s2] ss:$0 sm:$0xff]  ;;  %s211_s2 = smov [#allocation2]  }
   0x7   :  { %v178_v13 = vld [vmem:[%s276_s4] ss:$0 sm:$0xff]  ;;  %s133_s3 = sshll.u32 %s211_s2, 4  ;;  %s135_s4 = sshll.u32 %s277_s5, 4  ;;  %s134_s3 = int_to_ptr.vmem [resolvable:$true] %s133_s3  ;;  %s136_s4 = int_to_ptr.hbm [resolvable:$true] %s135_s4 }
   0x9   :  { %109 = vmatpush.bf16.msra.mxu1 %v174_v6 }
   0xa   :  { %69 = vmatpush.bf16.msra.mxu0 %v171_v2 }
   0xe   :  { %70 = vmatpush.bf16.msra.mxu0 %v170_v3 }
  0x11   :  { %160 = vmatmul.msk.bf16.vlgmr.msra.gmra.mxu0 %vm59_vm0, %v22_v4 }
  0x8e   :  { %v72_v8 = vpop.f32.mrf.mxu0 }
  0x8f   :  { %v73_v9 = vadd.f32 %v177_v7, %v72_v8 }
  0x91   :  { %179 = vtanh.f32 %v73_v9 }
  0x96   :  { %v74_v10 = vpop.f32.mrf.mxu0 }
  0x97   :  { %v180_v11 = vpop.eup %179 }
  0x98   :  { %v77_v12 = vpack.c.bf16 %v180_v11, %v180_v11 }
  0x9a   :  { %169 = vmatmul.msk.bf16.vlgmr.msra.gmra.mxu1 %vm98_vm1, %v77_v12 }
 0x117   :  { %v111_v14 = vpop.f32.mrf.mxu1 }
 0x118   :  { %v112_v15 = vadd.f32 %v178_v13, %v111_v14 }
 0x11a   :  { %v116_v16 = vsel %vm115_vm2, %v112_v15, -inf }
 0x11b   :  { %117 = vmax.xlane.f32.xlu0 %v116_v16 }
 0x11f   :  { %v113_v17 = vpop.f32.mrf.mxu1 }
 0x18e   :  { %v118_v18 = vpop.xlane.xlu0 %117 }
 0x18f   :  { %v119_v19 = vsub.f32 %v112_v15, %v118_v18 }
 0x191   :  { %v120_v20 = vmul.f32 1.442695, %v119_v19 }
 0x193   :  { %181 = vpow2.f32 %v120_v20 }
 0x199   :  { %v182_v21 = vpop.eup %181 }
 0x19a   :  { %v122_v22 = vsel %vm115_vm2, %v182_v21, 0.0 }
 0x19b   :  { %123 = vadd.xlane.f32.xlu0 %v122_v22 }
 0x20e   :  { %v124_v23 = vpop.xlane.xlu0 %123 }
 0x20f   :  { %183 = vrcp.f32 %v124_v23 }
 0x215   :  { %v184_v24 = vpop.eup %183 }
 0x216   :  { %v126_v25 = vmul.f32 %v184_v24, %v182_v21 }
 0x218   :  { %127 = vst [vmem:[#allocation2] sm:$0x3] %v126_v25 }
 0x219   :  { %138 = dma.vmem_to_hbm [thread:$0]  %s134_s3, 32, %s136_s4, [#allocation3]  }
 0x21a   :  { %209 = dma.done.wait [#allocation3], 32  }
 0x21b   :  { %210 = vsyncadd [#allocation3], 4294967264 }
 0x21c   :  { %143 = vsyncpa [#allocation3], 1 }

</bundles_post_ra>
